<compile_context>
chip_gen: v7x
topology: tpu7x:2x2x1
jax: 0.10.0
libtpu: 0.0.40
codegen_flags: <defaults>
</compile_context>

<pallas_src>
import math
import functools

import jax
import jax.numpy as jnp
from jax.experimental import pallas as pl
from jax.experimental.pallas import tpu as pltpu


def make_positional_encoding_table(d_model: int, max_len: int,
                                   dtype=jnp.float32) -> jnp.ndarray:
    """Mirrors the PyTorch buffer: pe[pos, 2i] = sin, pe[pos, 2i+1] = cos.

    Build the table directly in the activation dtype (review item #1) so no
    per-tile cast / extra HBM bytes are needed inside the kernel.  sin/cos are
    computed in f32 and cast once at the end.
    """
    if d_model % 2 != 0:
        raise ValueError("d_model must be even (same limitation as the PyTorch module)")
    position = jnp.arange(max_len, dtype=jnp.float32)[:, None]              # (max_len, 1)
    div_term = jnp.exp(
        jnp.arange(0, d_model, 2, dtype=jnp.float32) * (-math.log(10000.0) / d_model)
    )                                                                        # (d_model//2,)
    pe = jnp.zeros((max_len, d_model), dtype=jnp.float32)
    pe = pe.at[:, 0::2].set(jnp.sin(position * div_term))
    pe = pe.at[:, 1::2].set(jnp.cos(position * div_term))
    return pe.astype(dtype)                                                  # (max_len, d_model)


def _pe_add_kernel(x_ref, pe_ref, o_ref):
    # x_ref / o_ref : (seq_tile, B*D)  -- lane-dense slab
    # pe_ref        : (seq_tile, D)
    # NOTE: pe is already in the activation dtype (pre-cast at construction).
    d = pe_ref.shape[-1]
    n_batch = o_ref.shape[-1] // d
    pe = pe_ref[...]
    if n_batch > 1:
        # Broadcast over the batch axis in-VMEM with a single lane-axis
        # concatenate, so the whole block is ONE full-width add and ONE
        # full-width store (no per-batch masked partial stores, no B-way
        # unrolled load/add/store streams).  The concat is VPU/XLU work that
        # hides completely under the HBM DMA of this memory-bound kernel.
        pe = jnp.concatenate([pe] * n_batch, axis=-1)
    o_ref[...] = x_ref[...] + pe


def _sublane_multiple(itemsize: int) -> int:
    # 32-bit rows tile in groups of 8 sublanes; sub-32-bit dtypes pack
    # 4/itemsize rows per sublane, so keep the seq tile a multiple of the
    # packed row group (16 for bf16/fp16, 32 for int8/fp8) to avoid packed
    # partial-sublane masked stores on every tile.
    return 8 * max(1, 4 // max(1, itemsize))


def _default_seq_tile(S, B, D, itemsize, pe_itemsize,
                      target_tile_bytes=4 * 1024 * 1024,
                      vmem_budget_bytes=24 * 1024 * 1024):
    """Largest seq tile such that the double-buffered footprint
    (2x x-in + 2x out + 2x pe) stays inside a conservative VMEM budget,
    capped at ~4 MiB per x tile (diminishing returns beyond that; big enough
    to amortize the ~0.35us per-grid-step overhead even at v7x HBM BW)."""
    sub = _sublane_multiple(itemsize)
    x_row = B * D * itemsize
    pe_row = D * pe_itemsize
    per_row = 4 * x_row + 2 * pe_row
    rows = max(1, min(vmem_budget_bytes // per_row,
                      max(1, target_tile_bytes // x_row)))
    rows = min(rows, S)
    if rows >= sub:
        rows = (rows // sub) * sub      # layout-aligned, dtype-aware rounding
    elif S >= sub:
        rows = sub                      # minimum aligned tile
    else:
        rows = S                        # tiny S: single full-extent block
    return int(rows)


@functools.partial(jax.jit,
                   static_argnames=("seq_tile", "donate_x", "seq_dim_semantics"))
def positional_encoding_forward(x: jnp.ndarray, pe: jnp.ndarray,
                                seq_tile=None, donate_x: bool = False,
                                seq_dim_semantics="parallel"):
    """x: (S, B, D); pe: (max_len, D) with max_len >= S.  Returns x + pe[:S].

    donate_x=True aliases the activation buffer with the output
    (input_output_aliases={0: 0}) for the production path.
    On v7x pass seq_dim_semantics=pltpu.CORE_PARALLEL to shard the sequence
    axis across both TensorCores.
    """
    S, B, D = x.shape

    # One-off safety net: the table should already be built in x.dtype
    # (make_positional_encoding_table(dtype=...)); never cast per-tile in-kernel.
    if pe.dtype != x.dtype:
        pe = pe.astype(x.dtype)

    if seq_tile is None:
        seq_tile = _default_seq_tile(S, B, D, x.dtype.itemsize, pe.dtype.itemsize)
    seq_tile = int(min(seq_tile, S))
    if seq_tile != S and seq_tile % 8 != 0:
        raise ValueError("seq_tile must be a multiple of 8 or the full sequence length")
    num_tiles = pl.cdiv(S, seq_tile)

    # Free reshape (merges trailing contiguous dims): last block dim is B*D lanes.
    x2 = x.reshape(S, B * D)

    # pe is fed whole (no wrapper-side slice / extra HBM pass): the grid only
    # covers ceil(S/seq_tile) blocks so the index_map restricts reads to
    # pe[:S].  Only when the tile is not sublane-aligned (tiny S, seq_tile==S)
    # do we fall back to a full-extent pe block.
    pe_in = pe if seq_tile % 8 == 0 else pe[:S]

    # Explicit scoped-VMEM limit sized from the real double-buffered footprint
    # (2x in + 2x out + 2x pe) so large B*D never trips v5e's 16 MiB default,
    # while staying well under every generation's physical VMEM.
    x_tile_bytes = seq_tile * B * D * x.dtype.itemsize
    pe_tile_bytes = seq_tile * D * pe.dtype.itemsize
    footprint = 4 * x_tile_bytes + 2 * pe_tile_bytes
    vmem_limit = int(min(48 * 1024 * 1024,
                         max(footprint + (4 << 20), 16 * 1024 * 1024)))

    # Advisory hint: cheap, bandwidth-bound pass (helps XLA overlap neighbors).
    cost = pl.CostEstimate(
        flops=S * B * D,
        transcendentals=0,
        bytes_accessed=2 * S * B * D * x.dtype.itemsize
        + min(S, pe_in.shape[0]) * D * pe.dtype.itemsize,
    )

    out2 = pl.pallas_call(
        _pe_add_kernel,
        out_shape=jax.ShapeDtypeStruct((S, B * D), x.dtype),
        grid_spec=pltpu.PrefetchScalarGridSpec(
            num_scalar_prefetch=0,
            grid=(num_tiles,),
            in_specs=[
                pl.BlockSpec((seq_tile, B * D), lambda i: (i, 0)),
                pl.BlockSpec((seq_tile, D), lambda i: (i, 0)),
            ],
            out_specs=pl.BlockSpec((seq_tile, B * D), lambda i: (i, 0)),
        ),
        compiler_params=pltpu.CompilerParams(
            dimension_semantics=(seq_dim_semantics,),
            vmem_limit_bytes=vmem_limit,
        ),
        cost_estimate=cost,
        input_output_aliases=({0: 0} if donate_x else {}),
    )(x2, pe_in)

    # TODO(synk): nn.Dropout(0.1) in training mode is stochastic and cannot match
    # PyTorch's RNG; eval-mode dropout (identity) is applied here.
    # NOTE: for low-precision x, PyTorch promotes (half + f32 -> f32); here pe is
    # pre-cast to x.dtype so the add happens in x.dtype (tiny rounding delta).
    return out2.reshape(S, B, D)


def positional_encoding_ref(x, pe):
    # Pure-JAX reference for correctness checking.
    return x + pe[: x.shape[0]].astype(x.dtype)[:, None, :]


if __name__ == "__main__":
    d_model = 32
    max_len = 64        # small stand-in for 5000 (table is only read up to seq_len)
    batch = 2

    pe = make_positional_encoding_table(d_model, max_len, dtype=jnp.float32)
    key = jax.random.PRNGKey(0)

    # Case 1: default auto-sized tile (single grid step at this toy size).
    seq_len = 8
    x = jax.random.normal(key, (seq_len, batch, d_model), dtype=jnp.float32)
    out = jax.block_until_ready(positional_encoding_forward(x, pe))
    ref = positional_encoding_ref(x, pe)
    assert out.shape == (seq_len, batch, d_model)
    assert jnp.allclose(out, ref, atol=1e-6, rtol=1e-6)

    # Case 2: multi-step grid with a partial trailing block (S not a multiple
    # of seq_tile) to exercise boundary masking.
    seq_len2 = 20
    x2 = jax.random.normal(jax.random.PRNGKey(1), (seq_len2, batch, d_model),
                           dtype=jnp.float32)
    out2 = jax.block_until_ready(positional_encoding_forward(x2, pe, seq_tile=8))
    ref2 = positional_encoding_ref(x2, pe)
    assert out2.shape == (seq_len2, batch, d_model)
    assert jnp.allclose(out2, ref2, atol=1e-6, rtol=1e-6)

    # Case 3: production path with the activation buffer aliased to the output.
    out3 = jax.block_until_ready(positional_encoding_forward(x2, pe, donate_x=True))
    assert jnp.allclose(out3, ref2, atol=1e-6, rtol=1e-6)

    print("KERNEL_OK")
</pallas_src>

<mosaic_0001>
module attributes {stable_mosaic.version = 11 : i64} {
  func.func @_pe_add_kernel(%arg0: i32, %arg1: memref<8x64xf32, #tpu.memory_space<vmem>>, %arg2: memref<8x32xf32, #tpu.memory_space<vmem>>, %arg3: memref<8x64xf32, #tpu.memory_space<vmem>>) attributes {dimension_semantics = [#tpu.dimension_semantics<parallel>], iteration_bounds = array<i64: 1>, scalar_prefetch = 0 : i64, scratch_operands = 0 : i64, tpu.core_type = #tpu.core_type<tc>, window_params = [{transform_indices = @transform_0, window_bounds = array<i64: 8, 64>}, {transform_indices = @transform_1, window_bounds = array<i64: 8, 32>}, {transform_indices = @transform_2, window_bounds = array<i64: 8, 64>}]} {
    %c0 = arith.constant 0 : index
    %c0_0 = arith.constant 0 : index
    %0 = vector.load %arg2[%c0, %c0_0] : memref<8x32xf32, #tpu.memory_space<vmem>>, vector<8x32xf32>
    %1 = tpu.concatenate %0, %0 in 1 : vector<8x32xf32>, vector<8x32xf32> -> vector<8x64xf32>
    %c0_1 = arith.constant 0 : index
    %c0_2 = arith.constant 0 : index
    %2 = vector.load %arg1[%c0_1, %c0_2] : memref<8x64xf32, #tpu.memory_space<vmem>>, vector<8x64xf32>
    %3 = arith.addf %2, %1 : vector<8x64xf32>
    %c0_3 = arith.constant 0 : index
    %c0_4 = arith.constant 0 : index
    %4 = vector.load %arg3[%c0_3, %c0_4] : memref<8x64xf32, #tpu.memory_space<vmem>>, vector<8x64xf32>
    tpu.vector_store %arg3[%c0_3, %c0_4], %3 {strides = array<i32>} : memref<8x64xf32, #tpu.memory_space<vmem>>, vector<8x64xf32>,
    return
  }
  func.func @transform_0(%arg0: i32) -> (i32, i32) {
    %c0_i32 = arith.constant 0 : i32
    %c0_i32_0 = arith.constant 0 : i32
    return %arg0, %c0_i32 : i32, i32
  }
  func.func @transform_1(%arg0: i32) -> (i32, i32) {
    %c0_i32 = arith.constant 0 : i32
    %c0_i32_0 = arith.constant 0 : i32
    return %arg0, %c0_i32 : i32, i32
  }
  func.func @transform_2(%arg0: i32) -> (i32, i32) {
    %c0_i32 = arith.constant 0 : i32
    %c0_i32_0 = arith.constant 0 : i32
    return %arg0, %c0_i32 : i32, i32
  }
}

</mosaic_0001>

<bundles_post_ra>
// kernel: positional_encoding_forward.1
= control target key start
LH: loop header
LB: loop body
LE: loop exit
PB: predicated region body
PF: predicated region fallthrough
CT: control target
= control target key end

     0   :  { %s27_s11 = smov 32   ;;  %vm16_vm0 = vcmask 261120   ;;  %vm20_vm1 = vcmask 523264   ;;  %s52_s1 = inlined_call_operand.vmem [shape: f32[64,32], index: 1, kind: input, shape index: {}]   ;;  %s53_s0 = inlined_call_operand.vmem [shape: f32[8,64], index: 0, kind: input, shape index: {}]   ;;  %s54_s2 = inlined_call_operand.vmem [shape: f32[8,64], index: 2, kind: output, shape index: {}]  }
   0x1   :  { %v11_v0 = vld [vmem:[%s52_s1] sm:$0xff] }
   0x2   :  { %13 = vrot.lane.b32.xlu0 %v11_v0, %s27_s11  ;;  %v18_v1 = vld [vmem:[%s53_s0] sm:$0xff] }
  0x74   :  { %v14_v2 = vpop.permute.xlu0 %13 }
  0x75   :  { %v17_v3 = vsel %vm16_vm0, %v11_v0, %v14_v2 }
  0x76   :  { %v19_v4 = vadd.f32 %v18_v1, %v17_v3 }
  0x78   :  { %21 = vst.msk [vmem:[%s54_s2] sm:$0xff] %vm20_vm1, %v19_v4 }

</bundles_post_ra>
